<compile_context>
chip_gen: v7x
topology: tpu7x:2x2x1
jax: 0.10.0
libtpu: 0.0.40
codegen_flags: <defaults>
</compile_context>

<pallas_src>
import jax
import jax.numpy as jnp
from jax.experimental import pallas as pl
from jax.experimental.pallas import tpu as pltpu

LANE = 128


def adver_seq_cls_kernel(x_ref, ws_ref, bs_ref, wp_ref, bp_ref, wc_ref, bc_ref,
                         o_ref):
    tb, S, F = x_ref.shape

    # ---- sent2vec stand-in: Linear(F -> Hs) + tanh over every sentence ------
    # TODO(synk): sent2vec is an injected sentence encoder; modeled as a single
    # Linear + tanh layer.
    x2d = x_ref[...].reshape(tb * S, F)                              # bf16 [tb*S, F]
    sent_vecs = jnp.tanh(
        jnp.dot(x2d, ws_ref[...], preferred_element_type=jnp.float32)
        + bs_ref[...])                                               # f32 [tb*S, Hs]

    # ---- prop_model stand-in: mean over the S sentences of each sequence,
    #      then Linear(Hs -> Hp) + tanh ---------------------------------------
    # TODO(synk): prop_model is an injected propagation module; modeled as
    # mean-pool + Linear + tanh producing prop_hidden_size features.
    pooled = jnp.sum(sent_vecs.reshape(tb, S, -1), axis=1) * (1.0 / S)  # [tb, Hs]
    seq_outs = jnp.tanh(
        jnp.dot(pooled.astype(wp_ref.dtype), wp_ref[...],
                preferred_element_type=jnp.float32)
        + bp_ref[...])                                               # f32 [tb, Hp]

    # ---- grad_reverse: identity in the forward pass --------------------------

    # ---- classifier Linear(Hp -> L_pad) + softmax(dim=1) ----------------------
    # Padded class columns carry bias -1e30 -> exp == 0, so they never perturb
    # the softmax over the real label columns.
    logits = (jnp.dot(seq_outs.astype(wc_ref.dtype), wc_ref[...],
                      preferred_element_type=jnp.float32)
              + bc_ref[...])                                         # f32 [tb, Lp]
    m = jnp.max(logits, axis=1, keepdims=True)
    e = jnp.exp(logits - m)
    denom = jnp.sum(e, axis=1, keepdims=True)
    o_ref[...] = e * pl.reciprocal(denom, approx=True)


def adver_seq_cls_forward(sent_feats, params, *, tb=8):
    """sent_feats: [B, S, F] bf16 sentence features (B sequences of S sentences)."""
    B, S, F = sent_feats.shape
    Hs = params["w_s2v"].shape[1]
    Hp = params["w_prop"].shape[1]
    L = params["w_cls"].shape[1]
    L_pad = pl.cdiv(L, LANE) * LANE

    tb = min(tb, B)
    grid_b = pl.cdiv(B, tb)
    B_pad = grid_b * tb
    if B_pad != B:
        sent_feats = jnp.pad(sent_feats, ((0, B_pad - B), (0, 0), (0, 0)))

    x = sent_feats.astype(jnp.bfloat16)

    # Lane-dense classifier: pad out to L_pad (=128) columns; padded columns get
    # a very negative bias so their softmax probability is exactly zero.
    w_cls = jnp.zeros((Hp, L_pad), jnp.bfloat16).at[:, :L].set(params["w_cls"])
    b_cls = jnp.full((1, L_pad), -1e30, jnp.float32).at[:, :L].set(params["b_cls"])

    # TODO(synk): if the real F is large, add a K-reduction grid axis streaming
    # (tk, Hs) slices of w_s2v with a VMEM f32 accumulator + pl.when init/final,
    # instead of holding the whole (F, Hs) weight resident.
    grid_spec = pltpu.PrefetchScalarGridSpec(
        num_scalar_prefetch=0,
        grid=(grid_b,),
        in_specs=[
            pl.BlockSpec((tb, S, F), lambda i: (i, 0, 0)),     # activations: tiled
            pl.BlockSpec((F, Hs), lambda i: (0, 0)),           # weights: resident
            pl.BlockSpec((1, Hs), lambda i: (0, 0)),
            pl.BlockSpec((Hs, Hp), lambda i: (0, 0)),
            pl.BlockSpec((1, Hp), lambda i: (0, 0)),
            pl.BlockSpec((Hp, L_pad), lambda i: (0, 0)),
            pl.BlockSpec((1, L_pad), lambda i: (0, 0)),
        ],
        out_specs=pl.BlockSpec((tb, L_pad), lambda i: (i, 0)),
    )

    out = pl.pallas_call(
        adver_seq_cls_kernel,
        out_shape=jax.ShapeDtypeStruct((B_pad, L_pad), jnp.float32),
        grid_spec=grid_spec,
        compiler_params=pltpu.CompilerParams(
            dimension_semantics=("parallel",),        # v7x: both TCs split the grid
            vmem_limit_bytes=48 * 1024 * 1024,        # > 32 MiB default, < v7x 64 MiB
        ),
    )(x, params["w_s2v"], params["b_s2v"],
      params["w_prop"], params["b_prop"], w_cls, b_cls)

    return out[:B, :L]


def init_params(key, F, Hs, Hp, L):
    """Deterministic synthetic parameters (PyTorch-Linear-style uniform init).

    Weights are stored bf16 (MXU-native, half the HBM bytes); biases stay f32
    since they are added to f32 accumulators.
    """
    ks = jax.random.split(key, 6)

    def lin(kw, kb, fan_in, fan_out):
        bound = 1.0 / (fan_in ** 0.5)
        w = jax.random.uniform(kw, (fan_in, fan_out), jnp.float32, -bound, bound)
        b = jax.random.uniform(kb, (1, fan_out), jnp.float32, -bound, bound)
        return w.astype(jnp.bfloat16), b

    w_s2v, b_s2v = lin(ks[0], ks[1], F, Hs)
    w_prop, b_prop = lin(ks[2], ks[3], Hs, Hp)
    w_cls, b_cls = lin(ks[4], ks[5], Hp, L)
    return dict(w_s2v=w_s2v, b_s2v=b_s2v,
                w_prop=w_prop, b_prop=b_prop,
                w_cls=w_cls, b_cls=b_cls)


def reference_forward(sent_feats, params):
    """Pure-JAX reference mirroring the kernel's bf16-matmul / f32-accum math."""
    sv = jnp.tanh(
        jnp.einsum("bsf,fh->bsh", sent_feats, params["w_s2v"],
                   preferred_element_type=jnp.float32) + params["b_s2v"])
    pooled = sv.mean(axis=1)
    seq_outs = jnp.tanh(
        jnp.dot(pooled.astype(jnp.bfloat16), params["w_prop"],
                preferred_element_type=jnp.float32) + params["b_prop"])
    logits = (jnp.dot(seq_outs.astype(jnp.bfloat16), params["w_cls"],
                      preferred_element_type=jnp.float32) + params["b_cls"])
    return jax.nn.softmax(logits, axis=1)


if __name__ == "__main__":
    # Small but lane-dense shapes: 16 sequences x 16 sentences, 128-d sentence
    # features, sent_hidden=128, prop_hidden_size=128, label_cnt=2.
    B, S, F, Hs, Hp, L = 16, 16, 128, 128, 128, 2

    key = jax.random.PRNGKey(0)
    k_x, k_p = jax.random.split(key)
    sent_feats = jax.random.normal(k_x, (B, S, F), jnp.float32).astype(jnp.bfloat16)
    params = init_params(k_p, F, Hs, Hp, L)

    preds = adver_seq_cls_forward(sent_feats, params, tb=8)
    preds = jax.block_until_ready(preds)

    ref = reference_forward(sent_feats, params)
    assert preds.shape == (B, L)
    assert jnp.allclose(preds, ref, atol=5e-3, rtol=5e-3), "mismatch vs reference"
    assert jnp.allclose(preds.sum(axis=1), 1.0, atol=5e-3), "softmax rows must sum to 1"

    print("KERNEL_OK")
</pallas_src>

<mosaic_0001>
module attributes {stable_mosaic.version = 11 : i64} {
  func.func @adver_seq_cls_kernel(%arg0: i32, %arg1: memref<8x16x128xbf16, #tpu.memory_space<vmem>>, %arg2: memref<128x128xbf16, #tpu.memory_space<vmem>>, %arg3: memref<1x128xf32, #tpu.memory_space<vmem>>, %arg4: memref<128x128xbf16, #tpu.memory_space<vmem>>, %arg5: memref<1x128xf32, #tpu.memory_space<vmem>>, %arg6: memref<128x128xbf16, #tpu.memory_space<vmem>>, %arg7: memref<1x128xf32, #tpu.memory_space<vmem>>, %arg8: memref<8x128xf32, #tpu.memory_space<vmem>>) attributes {dimension_semantics = [#tpu.dimension_semantics<parallel>], iteration_bounds = array<i64: 2>, scalar_prefetch = 0 : i64, scratch_operands = 0 : i64, tpu.core_type = #tpu.core_type<tc>, window_params = [{transform_indices = @transform_0, window_bounds = array<i64: 8, 16, 128>}, {pipeline_mode = #tpu.pipeline_mode<synchronous>, transform_indices = @transform_1, window_bounds = array<i64: 128, 128>}, {pipeline_mode = #tpu.pipeline_mode<synchronous>, transform_indices = @transform_2, window_bounds = array<i64: 1, 128>}, {pipeline_mode = #tpu.pipeline_mode<synchronous>, transform_indices = @transform_3, window_bounds = array<i64: 128, 128>}, {pipeline_mode = #tpu.pipeline_mode<synchronous>, transform_indices = @transform_4, window_bounds = array<i64: 1, 128>}, {pipeline_mode = #tpu.pipeline_mode<synchronous>, transform_indices = @transform_5, window_bounds = array<i64: 128, 128>}, {pipeline_mode = #tpu.pipeline_mode<synchronous>, transform_indices = @transform_6, window_bounds = array<i64: 1, 128>}, {transform_indices = @transform_7, window_bounds = array<i64: 8, 128>}]} {
    %c0 = arith.constant 0 : index
    %c0_0 = arith.constant 0 : index
    %c0_1 = arith.constant 0 : index
    %0 = vector.load %arg1[%c0, %c0_0, %c0_1] : memref<8x16x128xbf16, #tpu.memory_space<vmem>>, vector<8x16x128xbf16>
    %1 = vector.shape_cast %0 : vector<8x16x128xbf16> to vector<128x128xbf16>
    %c0_2 = arith.constant 0 : index
    %c0_3 = arith.constant 0 : index
    %2 = vector.load %arg2[%c0_2, %c0_3] : memref<128x128xbf16, #tpu.memory_space<vmem>>, vector<128x128xbf16>
    %cst = arith.constant dense<0.000000e+00> : vector<128x128xf32>
    %3 = tpu.matmul %1, %2, %cst {dimension_numbers = #tpu.dot_dimension_numbers<[1], [0], [0], [1], [0, 0, 1, 1], [], []>} : vector<128x128xbf16>, vector<128x128xbf16>, vector<128x128xf32> -> vector<128x128xf32>
    %c0_4 = arith.constant 0 : index
    %c0_5 = arith.constant 0 : index
    %4 = vector.load %arg3[%c0_4, %c0_5] : memref<1x128xf32, #tpu.memory_space<vmem>>, vector<1x128xf32>
    %5 = vector.broadcast %4 : vector<1x128xf32> to vector<128x128xf32>
    %6 = arith.addf %3, %5 : vector<128x128xf32>
    %7 = math.tanh %6 : vector<128x128xf32>
    %8 = vector.shape_cast %7 : vector<128x128xf32> to vector<8x16x128xf32>
    %cst_6 = arith.constant dense<0.000000e+00> : vector<8x128xf32>
    %9 = vector.multi_reduction <add>, %8, %cst_6 [1] : vector<8x16x128xf32> to vector<8x128xf32>
    %cst_7 = arith.constant 6.250000e-02 : f32
    %10 = vector.broadcast %cst_7 : f32 to vector<8x128xf32>
    %11 = arith.mulf %9, %10 : vector<8x128xf32>
    %12 = arith.truncf %11 : vector<8x128xf32> to vector<8x128xbf16>
    %c0_8 = arith.constant 0 : index
    %c0_9 = arith.constant 0 : index
    %13 = vector.load %arg4[%c0_8, %c0_9] : memref<128x128xbf16, #tpu.memory_space<vmem>>, vector<128x128xbf16>
    %cst_10 = arith.constant dense<0.000000e+00> : vector<8x128xf32>
    %14 = tpu.matmul %12, %13, %cst_10 {dimension_numbers = #tpu.dot_dimension_numbers<[1], [0], [0], [1], [0, 0, 1, 1], [], []>} : vector<8x128xbf16>, vector<128x128xbf16>, vector<8x128xf32> -> vector<8x128xf32>
    %c0_11 = arith.constant 0 : index
    %c0_12 = arith.constant 0 : index
    %15 = vector.load %arg5[%c0_11, %c0_12] : memref<1x128xf32, #tpu.memory_space<vmem>>, vector<1x128xf32>
    %16 = vector.broadcast %15 : vector<1x128xf32> to vector<8x128xf32>
    %17 = arith.addf %14, %16 : vector<8x128xf32>
    %18 = math.tanh %17 : vector<8x128xf32>
    %19 = arith.truncf %18 : vector<8x128xf32> to vector<8x128xbf16>
    %c0_13 = arith.constant 0 : index
    %c0_14 = arith.constant 0 : index
    %20 = vector.load %arg6[%c0_13, %c0_14] : memref<128x128xbf16, #tpu.memory_space<vmem>>, vector<128x128xbf16>
    %cst_15 = arith.constant dense<0.000000e+00> : vector<8x128xf32>
    %21 = tpu.matmul %19, %20, %cst_15 {dimension_numbers = #tpu.dot_dimension_numbers<[1], [0], [0], [1], [0, 0, 1, 1], [], []>} : vector<8x128xbf16>, vector<128x128xbf16>, vector<8x128xf32> -> vector<8x128xf32>
    %c0_16 = arith.constant 0 : index
    %c0_17 = arith.constant 0 : index
    %22 = vector.load %arg7[%c0_16, %c0_17] : memref<1x128xf32, #tpu.memory_space<vmem>>, vector<1x128xf32>
    %23 = vector.broadcast %22 : vector<1x128xf32> to vector<8x128xf32>
    %24 = arith.addf %21, %23 : vector<8x128xf32>
    %cst_18 = arith.constant dense<0xFF800000> : vector<8xf32>
    %25 = vector.multi_reduction <maximumf>, %24, %cst_18 [1] : vector<8x128xf32> to vector<8xf32>
    %26 = vector.shape_cast %25 : vector<8xf32> to vector<8x1xf32>
    %27 = vector.broadcast %26 : vector<8x1xf32> to vector<8x128xf32>
    %28 = arith.subf %24, %27 : vector<8x128xf32>
    %29 = math.exp %28 : vector<8x128xf32>
    %cst_19 = arith.constant dense<0.000000e+00> : vector<8xf32>
    %30 = vector.multi_reduction <add>, %29, %cst_19 [1] : vector<8x128xf32> to vector<8xf32>
    %31 = vector.shape_cast %30 : vector<8xf32> to vector<8x1xf32>
    %32 = tpu.reciprocal %31 {approx = true} : vector<8x1xf32> -> vector<8x1xf32>
    %33 = vector.broadcast %32 : vector<8x1xf32> to vector<8x128xf32>
    %34 = arith.mulf %29, %33 : vector<8x128xf32>
    %c0_20 = arith.constant 0 : index
    %c0_21 = arith.constant 0 : index
    %35 = vector.load %arg8[%c0_20, %c0_21] : memref<8x128xf32, #tpu.memory_space<vmem>>, vector<8x128xf32>
    tpu.vector_store %arg8[%c0_20, %c0_21], %34 {strides = array<i32>} : memref<8x128xf32, #tpu.memory_space<vmem>>, vector<8x128xf32>,
    return
  }
  func.func @transform_0(%arg0: i32) -> (i32, i32, i32) {
    %c0_i32 = arith.constant 0 : i32
    %c0_i32_0 = arith.constant 0 : i32
    %c0_i32_1 = arith.constant 0 : i32
    return %arg0, %c0_i32, %c0_i32_0 : i32, i32, i32
  }
  func.func @transform_1(%arg0: i32) -> (i32, i32) {
    %c0_i32 = arith.constant 0 : i32
    %c0_i32_0 = arith.constant 0 : i32
    %c0_i32_1 = arith.constant 0 : i32
    return %c0_i32, %c0_i32_0 : i32, i32
  }
  func.func @transform_2(%arg0: i32) -> (i32, i32) {
    %c0_i32 = arith.constant 0 : i32
    %c0_i32_0 = arith.constant 0 : i32
    %c0_i32_1 = arith.constant 0 : i32
    return %c0_i32, %c0_i32_0 : i32, i32
  }
  func.func @transform_3(%arg0: i32) -> (i32, i32) {
    %c0_i32 = arith.constant 0 : i32
    %c0_i32_0 = arith.constant 0 : i32
    %c0_i32_1 = arith.constant 0 : i32
    return %c0_i32, %c0_i32_0 : i32, i32
  }
  func.func @transform_4(%arg0: i32) -> (i32, i32) {
    %c0_i32 = arith.constant 0 : i32
    %c0_i32_0 = arith.constant 0 : i32
    %c0_i32_1 = arith.constant 0 : i32
    return %c0_i32, %c0_i32_0 : i32, i32
  }
  func.func @transform_5(%arg0: i32) -> (i32, i32) {
    %c0_i32 = arith.constant 0 : i32
    %c0_i32_0 = arith.constant 0 : i32
    %c0_i32_1 = arith.constant 0 : i32
    return %c0_i32, %c0_i32_0 : i32, i32
  }
  func.func @transform_6(%arg0: i32) -> (i32, i32) {
    %c0_i32 = arith.constant 0 : i32
    %c0_i32_0 = arith.constant 0 : i32
    %c0_i32_1 = arith.constant 0 : i32
    return %c0_i32, %c0_i32_0 : i32, i32
  }
  func.func @transform_7(%arg0: i32) -> (i32, i32) {
    %c0_i32 = arith.constant 0 : i32
    %c0_i32_0 = arith.constant 0 : i32
    return %arg0, %c0_i32 : i32, i32
  }
}

</mosaic_0001>

<bundles_post_ra>
// kernel: tpu_custom_call.1
= control target key start
LH: loop header
LB: loop body
LE: loop exit
PB: predicated region body
PF: predicated region fallthrough
CT: control target
= control target key end

     0   :  { %12 = vsyncpa [#allocation3], 0  ;;  %s1921_s0 = inlined_call_operand.hbm [shape: bf16[16,16,128], index: 0, kind: input, shape index: {}]   ;;  %s1922_s1 = inlined_call_operand.hbm [shape: bf16[128,128], index: 1, kind: input, shape index: {}]   ;;  %s1923_s2 = inlined_call_operand.vmem [shape: f32[1,128], index: 2, kind: input, shape index: {}]   ;;  %s1924_s3 = inlined_call_operand.hbm [shape: bf16[128,128], index: 3, kind: input, shape index: {}]   ;;  %s1925_s4 = inlined_call_operand.vmem [shape: f32[1,128], index: 4, kind: input, shape index: {}]   ;;  %s1926_s5 = inlined_call_operand.hbm [shape: bf16[128,128], index: 5, kind: input, shape index: {}]   ;;  %s1927_s6 = inlined_call_operand.vmem [shape: f32[1,128], index: 6, kind: input, shape index: {}]   ;;  %s1928_s7 = inlined_call_operand.hbm [shape: f32[16,128], index: 7, kind: output, shape index: {}]  }
   0x1   :  { %14 = vsyncpa [#allocation3 + $0x1], 0 }
   0x2   :  { %15 = vsyncpa [#allocation6], 0 }
   0x3   :  { %16 = vsyncpa [#allocation9], 0 }
   0x4   :  { %17 = vsyncpa [#allocation4], 0 }
   0x5   :  { %19 = vsyncpa [#allocation4 + $0x1], 0  ;;  %s1596_s24 = smov 0   ;;  %s1598_s25 = smov 0  }
   0x6   :  { %s1600_s26 = smov 0   ;;  %s1602_s27 = smov 0  }
   0x7 LB: > { %s1617_s28 = sadd.s32 4294967295, %s1545_s27   ;;  %s1043_s29 = sadd.s32 4294967294, %s1545_s27   ;;  %s1545_s27 = sphi %s1602_s27, %s1954_s27   ;;  %s1541_s26 = sphi %s1600_s26, %s1953_s26   ;;  %s1537_s25 = sphi %s1598_s25, %s1952_s25   ;;  %s1533_s24 = sphi %s1596_s24, %s1951_s24  }
   0x8   : > { %p45_p0 = scmp.ne.s32.totalorder %s1537_s25, %s1533_s24  ;;  %p1929_p1 = scmp.eq.s32.totalorder %s1617_s28, 0 }
   0x9   : > { %p201_p3 = scmp.eq.s32.totalorder %s1043_s29, 1  ;;  %p1044_p5 = scmp.ge.s32.totalorder %s1545_s27, 1 }
   0xa   : > { %p1626_p4 = por %p1929_p1, %p45_p0  ;;  %p208_p7 = scmp.lt.s32.totalorder %s1545_s27, 3 }
   0xb   : > { %p1631_p6 = por %p201_p3, %p45_p0  ;;  %s1547_s10 = smov [#allocation5]  }
   0xc   : > { %s1933_s30 = scalar_select %p1626_p4, 1, 0 }
   0xd   : > { %s1934_s8 = scalar_select %p1631_p6, 1, 0 }
   0xe   : > { %p1636_p8 = pnand %p1044_p5, %p208_p7  ;;  %s220_s11 = sshll.u32 %s1547_s10, 4  ;;  %s1640_s11 = int_to_ptr.vmem [resolvable:$true] %s220_s11 }
   0xf   : > { %1935 = sst [smem:[#allocation15_spill]] %s1934_s8  ;;  %s1548_s13 = smov [#allocation7]  }
  0x10   : > { %s1936_s9 = scalar_select %p1636_p8, 1, 0 }
  0x11   : > { %p1222_p9 = pneg %p1636_p8  ;;  %s236_s14 = sshll.u32 %s1548_s13, 4  ;;  %s1651_s14 = int_to_ptr.vmem [resolvable:$true] %s236_s14 }
  0x12   : > { %s1549_s15 = smov [#allocation8]   ;;  %s1357_s19 = scalar_lea.hbm %s1922_s1, 1024 }
  0x13   : > { %p1647_p11 = pnand %p1222_p9, %p1929_p1  ;;  %s1653_s16 = sshll.u32 %s1549_s15, 4  ;;  %s253_s16 = int_to_ptr.vmem [resolvable:$true] %s1653_s16 }
  0x14   : > { %p1358_p12 = scmp.ne.s32.totalorder %s1922_s1, %s1357_s19  ;;  %p1364_p5 = scmp.lt.u32.totalorder %s1357_s19, %s1922_s1 }
  0x15   : > { %p1663_p13 = pneg %p1647_p11 }
  0x17   : > { %p1360_p0 = pnand %p1663_p13, %p1358_p12 }
  0x19   : > { %p1361_p3 = pneg %p1360_p0 }
  0x1b   : > { %p1366_p7 = pnand %p1364_p5, %p1361_p3 }
  0x1d   : > { %1369 = shalt.err (!%p1366_p7)
}
  0x1e   : > { %s1370_s10 = scalar_lea.vmem %s1640_s11, 1024  ;;  %p1378_p2 = scmp.lt.s32.totalorder %s1640_s11, %s1640_s11 }
  0x1f   : > { %p1371_p9 = scmp.ne.s32.totalorder %s1640_s11, %s1370_s10  ;;  %p1379_p6 = scmp.lt.s32.totalorder %s1370_s10, %s1370_s10 }
  0x21   : > { %p1373_p10 = pnand %p1371_p9, %p1663_p13  ;;  %p1380_p12 = por %p1379_p6, %p1378_p2 }
  0x23   : > { %p1374_p1 = pneg %p1373_p10 }
  0x25   : > { %p1381_p0 = pnand %p1380_p12, %p1374_p1 }
  0x27   : > { %1384 = shalt.err (!%p1381_p0)
}
  0x28   : > { %s1550_s13 = smov 64   ;;  %s1551_s15 = smov 4  }
  0x29   : > { %1225 = dma.hbm_to_vmem [thread:$0]  (!%p1647_p11), %s1922_s1, 1024, %s1640_s11, [#allocation6], %s1550_s13, %s1550_s13, %s1551_s15  }
  0x2a   : > { %s1385_s21 = scalar_lea.hbm %s1924_s3, 1024 }
  0x2b   : > { %p1386_p1 = scmp.ne.s32.totalorder %s1924_s3, %s1385_s21  ;;  %p1392_p10 = scmp.lt.u32.totalorder %s1385_s21, %s1924_s3 }
  0x2d   : > { %p1388_p2 = pnand %p1386_p1, %p1663_p13 }
  0x2f   : > { %p1389_p6 = pneg %p1388_p2 }
  0x31   : > { %p1394_p3 = pnand %p1392_p10, %p1389_p6 }
  0x33   : > { %1397 = shalt.err (!%p1394_p3)
}
  0x34   : > { %s1398_s11 = scalar_lea.vmem %s1651_s14, 1024  ;;  %p1406_p12 = scmp.lt.s32.totalorder %s1651_s14, %s1651_s14 }
  0x35   : > { %p1399_p5 = scmp.ne.s32.totalorder %s1651_s14, %s1398_s11  ;;  %p1407_p0 = scmp.lt.s32.totalorder %s1398_s11, %s1398_s11 }
  0x37   : > { %p1401_p7 = pnand %p1399_p5, %p1663_p13  ;;  %p1408_p1 = por %p1407_p0, %p1406_p12 }
  0x39   : > { %p1402_p9 = pneg %p1401_p7 }
  0x3b   : > { %p1409_p2 = pnand %p1408_p1, %p1402_p9 }
  0x3d   : > { %1412 = shalt.err (!%p1409_p2)
}
  0x3e   : > { %1228 = dma.hbm_to_vmem [thread:$0]  (!%p1647_p11), %s1924_s3, 1024, %s1651_s14, [#allocation6], %s1550_s13, %s1550_s13, %s1551_s15  }
  0x3f   : > { %s1413_s20 = scalar_lea.hbm %s1926_s5, 1024 }
  0x40   : > { %p1414_p6 = scmp.ne.s32.totalorder %s1926_s5, %s1413_s20  ;;  %p1420_p5 = scmp.lt.u32.totalorder %s1413_s20, %s1926_s5 }
  0x42   : > { %p1416_p10 = pnand %p1414_p6, %p1663_p13 }
  0x44   : > { %p1417_p3 = pneg %p1416_p10 }
  0x46   : > { %p1422_p7 = pnand %p1420_p5, %p1417_p3 }
  0x48   : > { %1425 = shalt.err (!%p1422_p7)
}
  0x49   : > { %s1426_s11 = scalar_lea.vmem %s253_s16, 1024  ;;  %p1434_p1 = scmp.lt.s32.totalorder %s253_s16, %s253_s16 }
  0x4a   : > { %p1427_p9 = scmp.ne.s32.totalorder %s253_s16, %s1426_s11  ;;  %p1435_p2 = scmp.lt.s32.totalorder %s1426_s11, %s1426_s11 }
  0x4c   : > { %p1429_p12 = pnand %p1427_p9, %p1663_p13  ;;  %p1436_p4 = por %p1435_p2, %p1434_p1 }
  0x4e   : > { %p1430_p0 = pneg %p1429_p12 }
  0x50   : > { %p1437_p8 = pnand %p1436_p4, %p1430_p0 }
  0x52   : > { %1440 = shalt.err (!%p1437_p8)
}
  0x53   : > { %1231 = dma.hbm_to_vmem [thread:$0]  (!%p1647_p11), %s1926_s5, 1024, %s253_s16, [#allocation9], %s1550_s13, %s1550_s13, %s1551_s15  }
  0x54   : > { %s1736_s22 = sadd.s32 1, %s1545_s27   ;;  %s32_s17 = sadd.s32 1, %s1541_s26 }
  0x55   : > { %s29_s12 = ssub.s32 %s1545_s27, %s1736_s22  ;;  %p39_p8 = scmp.ne.s32.totalorder %s1541_s26, %s1537_s25 }
  0x56   : > { %p30_p4 = scmp.eq.s32.totalorder %s29_s12, 0  ;;  %p40_p13 = scmp.eq.s32.totalorder %s1545_s27, 0 }
  0x57   : > { %p1243_p6 = scmp.lt.s32.totalorder %s1545_s27, 2  ;;  %p1939_p3 = scmp.eq.s32.totalorder %s1617_s28, 1 }
  0x58   : > { %s1746_s18 = scalar_select %p30_p4, %s1541_s26, %s32_s17  }
  0x59   : > { %p41_p10 = por %p40_p13, %p39_p8  ;;  %p1750_p5 = por %p1939_p3, %p39_p8 }
  0x5a   : > { %s269_s20 = sand.u32 1, %s1541_s26   ;;  %s1099_s21 = sshll.u32 %s1545_s27, 10 }
  0x5b   : > { %s1049_s16 = sshll.u32 %s269_s20, 6  ;;  %s1759_s10 = scalar_lea.hbm %s1921_s0, %s1099_s21 }
  0x5c   : > { %s273_s11 = scalar_lea.vmem [#allocation2], %s1049_s16  ;;  %p1761_p11 = pnand %p1243_p6, %p41_p10 }
  0x5d   : > { %s281_s14 = sshll.u32 %s273_s11, 4  ;;  %s1767_s12 = scalar_lea.sflag [#allocation3], %s269_s20  ;;  %s1765_s14 = int_to_ptr.vmem [resolvable:$true] %s281_s14 }
  0x5e   : > { %s1441_s17 = scalar_lea.hbm %s1759_s10, 1024  ;;  %p1443_p9 = pneg %p1761_p11 }
  0x5f   : > { %p1442_p7 = scmp.ne.s32.totalorder %s1759_s10, %s1441_s17  ;;  %s1446_s23 = scalar_lea.hbm %s1921_s0, 2048 }
  0x60   : > { %p1447_p1 = scmp.lt.u32.totalorder %s1759_s10, %s1921_s0  ;;  %p1448_p2 = scmp.lt.u32.totalorder %s1446_s23, %s1441_s17 }
  0x61   : > { %p1444_p12 = pnand %p1443_p9, %p1442_p7  ;;  %p1450_p8 = scmp.lt.u32.totalorder %s1441_s17, %s1759_s10 }
  0x62   : > { %p1449_p4 = por %p1448_p2, %p1447_p1 }
  0x63   : > { %p1445_p0 = pneg %p1444_p12 }
  0x64   : > { %p1451_p13 = por %p1450_p8, %p1449_p4 }
  0x66   : > { %p1452_p6 = pnand %p1451_p13, %p1445_p0 }
  0x68   : > { %1455 = shalt.err (!%p1452_p6)
}
  0x69   : > { %s1456_s20 = scalar_lea.vmem %s1765_s14, 1024  ;;  %s1552_s21 = smov [#allocation2]  }
  0x6a   : > { %p1457_p10 = scmp.ne.s32.totalorder %s1765_s14, %s1456_s20  ;;  %s1461_s16 = sshll.u32 %s1552_s21, 4  ;;  %s1462_s16 = int_to_ptr.vmem [resolvable:$false] %s1461_s16 }
  0x6b   : > { %s1463_s29 = scalar_lea.vmem %s1462_s16, 2048  ;;  %p1464_p12 = scmp.lt.s32.totalorder %s1765_s14, %s1462_s16 }
  0x6c   : > { %p1459_p3 = pnand %p1457_p10, %p1443_p9  ;;  %p1465_p1 = scmp.lt.s32.totalorder %s1463_s29, %s1456_s20 }
  0x6e   : > { %p1460_p7 = pneg %p1459_p3  ;;  %p1466_p2 = por %p1465_p1, %p1464_p12 }
  0x70   : > { %p1467_p4 = pnand %p1466_p2, %p1460_p7 }
  0x72   : > { %1470 = shalt.err (!%p1467_p4)
}
  0x73   : > { %1235 = dma.hbm_to_vmem [thread:$0]  (!%p1761_p11), %s1759_s10, 1024, %s1765_s14, %s1767_s12, %s1550_s13, %s1550_s13, %s1551_s15  }
  0x74   : > { %p1942_p9 = scmp.ne.s32.totalorder %s1936_s9, 0 }
  0x75   : > { %s1801_s17 = sand.u32 (!%p1942_p9), 1, %s1537_s25   ;;  %p1943_p0 = scmp.ne.s32.totalorder (!%p1942_p9), %s1933_s30, 0 }
  0x76   : > { %293 = sbr.rel (%p1942_p9) target bundleno = 1209 (0x4b9), region = 48  ;;  %s1054_s23 = sshll.u32 (!%p1942_p9), %s1801_s17, 6 }
  0x77   : > { %s296_s11 = scalar_lea.sflag (!%p1942_p9), [#allocation3], %s1801_s17  ;;  %s1805_s20 = scalar_lea.vmem (!%p1942_p9), [#allocation2], %s1054_s23 }
  0x7d   : > { %1516 = dma.done.wait (%p1943_p0), %s296_s11, 1024  }
  0x7e   : > { %1518 = vsyncadd (%p1943_p0), %s296_s11, 4294966272  ;;  %p1944_p11 = scmp.eq.s32.totalorder %s1617_s28, 0 }
  0x80   : > { %1520 = dma.done.wait (%p1944_p11), [#allocation6], 2048   ;;  %p1945_p8 = pmov %p1944_p11 }
  0x82   : > { %1522 = vsyncadd (%p1945_p8), [#allocation6], 4294965248  ;;  %p1946_p13 = pmov %p1945_p8 }
  0x83   : > { %p1947_p6 = pmov %p1945_p8 }
  0x84   : > { %1524 = dma.done.wait (%p1946_p13), [#allocation9], 1024  }
  0x85   : > { %1526 = vsyncadd (%p1947_p6), [#allocation9], 4294966272  ;;  %v1287_v0 = vld [vmem:[#allocation5] sm:$0xff]   ;;  %v1288_v1 = vld [vmem:[#allocation5 + $0x8] sm:$0xff]   ;;  %v1553_v17 = vmov 0.0   ;;  %vm1554_vm0 = vmmov 0  }
  0x86   : > { %1134 = vmatprep.subr.bf16.mxu0 %v1287_v0  ;;  %v1289_v2 = vld [vmem:[#allocation5 + $0x10] sm:$0xff]   ;;  %v1290_v3 = vld [vmem:[#allocation5 + $0x18] sm:$0xff]   ;;  %v1295_v4 = vld [vmem:[%s1805_s20] sm:$0xff]   ;;  %1166 = vmatprep.subr.bf16.mxu1 %v1553_v17  ;;  %vm703_vm1 = vcmask 1041409   ;;  %vm705_vm2 = vcmask 1042434   ;;  %vm707_vm3 = vcmask 1043459  }
  0x87   : > { %1135 = vmatpush3.bf16.msra.mxu0 %v1287_v0  ;;  %1150 = vmatprep.mubr.bf16.mxu0 %v1295_v4  ;;  %v1291_v5 = vld [vmem:[#allocation5 + $0x20] sm:$0xff]   ;;  %v1292_v6 = vld [vmem:[#allocation5 + $0x28] sm:$0xff]   ;;  %v1293_v7 = vld [vmem:[#allocation5 + $0x30] sm:$0xff]   ;;  %vm709_vm4 = vcmask 1044484   ;;  %vm711_vm5 = vcmask 1045509   ;;  %vm713_vm6 = vcmask 1046534  }
  0x88   : > { %1136 = vmatprep.subr.bf16.mxu0 %v1288_v1  ;;  %v1294_v8 = vld [vmem:[#allocation5 + $0x38] sm:$0xff]   ;;  %v1296_v9 = vld [vmem:[%s1805_s20 + $0x8] sm:$0xff]   ;;  %v1297_v10 = vld [vmem:[%s1805_s20 + $0x10] sm:$0xff]   ;;  %1182 = vmatprep.mubr.msk.bf16.mxu1 %vm1554_vm0, %v1553_v17  ;;  %vm715_vm7 = vcmask 1047559   ;;  %s1058_s8 = sshll.u32 %s1801_s17, 3  ;;  %s1095_s12 = sshll.u32 %s1617_s28, 7 }
  0x89   : > { %v1298_v11 = vld [vmem:[%s1805_s20 + $0x18] sm:$0xff]   ;;  %v1299_v12 = vld [vmem:[%s1805_s20 + $0x20] sm:$0xff]   ;;  %v1300_v13 = vld [vmem:[%s1805_s20 + $0x28] sm:$0xff]   ;;  %s341_s21 = scalar_lea.vmem [#allocation10], %s1058_s8  ;;  %s1877_s11 = scalar_lea.hbm %s1928_s7, %s1095_s12 }
  0x8a   : > { %v1301_v14 = vld [vmem:[%s1805_s20 + $0x30] sm:$0xff]   ;;  %v1302_v15 = vld [vmem:[%s1805_s20 + $0x38] sm:$0xff]   ;;  %v1303_v16 = vld [vmem:[#allocation7] sm:$0xff]   ;;  %s944_s16 = sshll.u32 %s341_s21, 4  ;;  %s931_s20 = scalar_lea.sflag [#allocation4], %s1801_s17  ;;  %s1879_s16 = int_to_ptr.vmem [resolvable:$true] %s944_s16 }
  0x8b   : > { %1137 = vmatpush3.bf16.msra.mxu0 %v1288_v1  ;;  %1167 = vmatpush3.bf16.msra.mxu1 %v1303_v16  ;;  %v1304_v18 = vld [vmem:[#allocation7 + $0x8] sm:$0xff]   ;;  %v1305_v19 = vld [vmem:[#allocation7 + $0x10] sm:$0xff]   ;;  %v1306_v20 = vld [vmem:[#allocation7 + $0x18] sm:$0xff]   ;;  %s1471_s30 = scalar_lea.vmem %s1879_s16, 128  ;;  %s1555_s28 = smov [#allocation10]  }
  0x8c   : > { %1138 = vmatprep.subr.bf16.mxu0 %v1289_v2  ;;  %1168 = vmatprep.subr.bf16.mxu1 %v1553_v17  ;;  %v1307_v21 = vld [vmem:[#allocation7 + $0x20] sm:$0xff]   ;;  %v1308_v22 = vld [vmem:[#allocation7 + $0x28] sm:$0xff]   ;;  %v1309_v23 = vld [vmem:[#allocation7 + $0x30] sm:$0xff]   ;;  %p1472_p10 = scmp.ne.s32.totalorder %s1879_s16, %s1471_s30  ;;  %s1475_s9 = sshll.u32 %s1555_s28, 4  ;;  %s1476_s9 = int_to_ptr.vmem [resolvable:$false] %s1475_s9 }
  0x8d   : > { %v1310_v24 = vld [vmem:[#allocation7 + $0x38] sm:$0xff]   ;;  %v1311_v25 = vld [vmem:[#allocation8] sm:$0xff]   ;;  %v1312_v26 = vld [vmem:[#allocation8 + $0x8] sm:$0xff]   ;;  %s1477_s13 = scalar_lea.vmem %s1476_s9, 256  ;;  %p1478_p12 = scmp.lt.s32.totalorder %s1879_s16, %s1476_s9 }
  0x8e   : > { %v1313_v27 = vld [vmem:[#allocation8 + $0x10] sm:$0xff]   ;;  %v1314_v28 = vld [vmem:[#allocation8 + $0x18] sm:$0xff]   ;;  %v1845_v29 = vld [vmem:[%s1923_s2] ss:$0 sm:$0xff]  ;;  %p1473_p3 = pnand %p1472_p10, %p1750_p5  ;;  %p1479_p1 = scmp.lt.s32.totalorder %s1477_s13, %s1471_s30 }
  0x8f   : > { %1139 = vmatpush3.bf16.msra.mxu0 %v1289_v2  ;;  %1169 = vmatpush3.bf16.msra.mxu1 %v1304_v18 }
  0x90   : > { %1140 = vmatprep.subr.bf16.mxu0 %v1290_v3  ;;  %1170 = vmatprep.subr.bf16.mxu1 %v1553_v17  ;;  %p1474_p7 = pneg %p1473_p3  ;;  %p1480_p2 = por %p1479_p1, %p1478_p12 }
  0x92   : > { %p1481_p4 = pnand %p1480_p2, %p1474_p7 }
  0x93   : > { %1141 = vmatpush3.bf16.msra.mxu0 %v1290_v3  ;;  %1171 = vmatpush3.bf16.msra.mxu1 %v1305_v19 }
  0x94   : > { %1142 = vmatprep.subr.bf16.mxu0 %v1291_v5  ;;  %1172 = vmatprep.subr.bf16.mxu1 %v1553_v17 }
  0x97   : > { %1143 = vmatpush3.bf16.msra.mxu0 %v1291_v5  ;;  %1173 = vmatpush3.bf16.msra.mxu1 %v1306_v20 }
  0x98   : > { %1144 = vmatprep.subr.bf16.mxu0 %v1292_v6  ;;  %1174 = vmatprep.subr.bf16.mxu1 %v1553_v17 }
  0x9b   : > { %1145 = vmatpush3.bf16.msra.mxu0 %v1292_v6  ;;  %1175 = vmatpush3.bf16.msra.mxu1 %v1307_v21 }
  0x9c   : > { %1146 = vmatprep.subr.bf16.mxu0 %v1293_v7  ;;  %1176 = vmatprep.subr.bf16.mxu1 %v1553_v17 }
  0x9f   : > { %1147 = vmatpush3.bf16.msra.mxu0 %v1293_v7  ;;  %1177 = vmatpush3.bf16.msra.mxu1 %v1308_v22 }
  0xa0   : > { %1148 = vmatprep.subr.bf16.mxu0 %v1294_v8  ;;  %1178 = vmatprep.subr.bf16.mxu1 %v1553_v17 }
  0xa3   : > { %1149 = vmatpush3.bf16.msra.mxu0 %v1294_v8  ;;  %1179 = vmatpush3.bf16.msra.mxu1 %v1309_v23 }
  0xa4   : > { %1186 = vmatprep.subr.bf16.mxu0 %v1553_v17  ;;  %1180 = vmatprep.subr.bf16.mxu1 %v1553_v17 }
  0xa6   : > { %1151 = vmatmul.mubr.bf16.vlgmr.msra.gmra.mrb[0].mxu0 %v1296_v9 }
  0xa7   : > { %1154 = vmatprep.mubr.bf16.mxu0 %v1297_v10  ;;  %1181 = vmatpush3.bf16.msra.mxu1 %v1310_v24 }
  0xa8   : > { %1187 = vmatpush3.bf16.msra.mxu0 %v1311_v25 }
  0xa9   : > { %1188 = vmatprep.subr.bf16.mxu0 %v1553_v17 }
  0xac   : > { %1189 = vmatpush3.bf16.msra.mxu0 %v1312_v26 }
  0xad   : > { %1190 = vmatprep.subr.bf16.mxu0 %v1553_v17 }
  0xae   : > { %1155 = vmatmul.mubr.bf16.gmra.mrb[4].mxu0 %v1298_v11 }
  0xaf   : > { %1158 = vmatprep.mubr.bf16.mxu0 %v1299_v12 }
  0xb0   : > { %1191 = vmatpush3.bf16.msra.mxu0 %v1313_v27 }
  0xb1   : > { %1192 = vmatprep.subr.bf16.mxu0 %v1553_v17 }
  0xb4   : > { %1193 = vmatpush3.bf16.msra.mxu0 %v1314_v28 }
  0xb5   : > { %1194 = vmatprep.subr.bf16.mxu0 %v1553_v17 }
  0xb6   : > { %1159 = vmatmul.mubr.bf16.gmra.mrb[8].mxu0 %v1300_v13 }
  0xb7   : > { %1162 = vmatprep.mubr.bf16.mxu0 %v1301_v14 }
  0xbe   : > { %1163 = vmatmul.mubr.bf16.gmra.mrb[12].mxu0 %v1302_v15 }
  0xbf   : > { %1202 = vmatprep.mubr.msk.bf16.mxu0 %vm1554_vm0, %v1553_v17 }
 0x179   : > { %v1152_v30 = vpop.f32.mrb[0].mxu0 }
 0x17a   : > { %v522_v31 = vadd.f32 %v1152_v30, %v1845_v29  ;;  %v513_v32 = vpop.f32.mrb[1].mxu0 }
 0x17b   : > { %v514_v33 = vadd.f32 %v1845_v29, %v513_v32  ;;  %v1153_v34 = vpop.f32.mrb[2].mxu0 }
 0x17c   : > { %1319 = vtanh.f32 %v522_v31  ;;  %v525_v35 = vadd.f32 %v1153_v34, %v1845_v29  ;;  %v516_v36 = vpop.f32.mrb[3].mxu0 }
 0x17d   : > { %1321 = vtanh.f32 %v514_v33  ;;  %v517_v37 = vadd.f32 %v1845_v29, %v516_v36 }
 0x17e   : > { %1323 = vtanh.f32 %v525_v35 }
 0x17f   : > { %1325 = vtanh.f32 %v517_v37 }
 0x181   : > { %v1156_v38 = vpop.f32.mrb[4].mxu0 }
 0x182   : > { %v538_v39 = vadd.f32 %v1156_v38, %v1845_v29  ;;  %v529_v40 = vpop.f32.mrb[5].mxu0 }
 0x183   : > { %v530_v41 = vadd.f32 %v1845_v29, %v529_v40  ;;  %v1157_v42 = vpop.f32.mrb[6].mxu0 }
 0x184   : > { %1327 = vtanh.f32 %v538_v39  ;;  %v541_v43 = vadd.f32 %v1157_v42, %v1845_v29  ;;  %v532_v44 = vpop.f32.mrb[7].mxu0 }
 0x185   : > { %1329 = vtanh.f32 %v530_v41  ;;  %v533_v45 = vadd.f32 %v1845_v29, %v532_v44 }
 0x186   : > { %v1320_v46 = vpop.eup %1319  ;;  %1331 = vtanh.f32 %v541_v43 }
 0x187   : > { %v1322_v47 = vpop.eup %1321  ;;  %1333 = vtanh.f32 %v533_v45 }
 0x188   : > { %v1324_v48 = vpop.eup %1323 }
 0x189   : > { %v1326_v49 = vpop.eup %1325  ;;  %v599_v50 = vadd.f32 %v1324_v48, %v1320_v46  ;;  %v1160_v51 = vpop.f32.mrb[8].mxu0 }
 0x18a   : > { %v592_v52 = vadd.f32 %v1326_v49, %v1322_v47  ;;  %v554_v53 = vadd.f32 %v1160_v51, %v1845_v29  ;;  %v545_v54 = vpop.f32.mrb[9].mxu0 }
 0x18b   : > { %v600_v55 = vrot.slane %v599_v50, 4  ;;  %v546_v56 = vadd.f32 %v1845_v29, %v545_v54  ;;  %v1161_v57 = vpop.f32.mrb[10].mxu0 }
 0x18c   : > { %v593_v58 = vrot.slane %v592_v52, 4  ;;  %1335 = vtanh.f32 %v554_v53  ;;  %v557_v59 = vadd.f32 %v1161_v57, %v1845_v29  ;;  %v548_v60 = vpop.f32.mrb[11].mxu0 }
 0x18d   : > { %v601_v61 = vadd.f32 %v600_v55, %v599_v50  ;;  %1337 = vtanh.f32 %v546_v56  ;;  %v549_v62 = vadd.f32 %v1845_v29, %v548_v60 }
 0x18e   : > { %v1328_v63 = vpop.eup %1327  ;;  %v594_v0 = vadd.f32 %v593_v58, %v592_v52  ;;  %1339 = vtanh.f32 %v557_v59 }
 0x18f   : > { %v1330_v1 = vpop.eup %1329  ;;  %v602_v2 = vrot.slane %v601_v61, 2  ;;  %1341 = vtanh.f32 %v549_v62 }
 0x190   : > { %v1332_v3 = vpop.eup %1331  ;;  %v595_v4 = vrot.slane %v594_v0, 2 }
 0x191   : > { %v1334_v5 = vpop.eup %1333  ;;  %v603_v6 = vadd.f32 %v602_v2, %v601_v61  ;;  %v613_v7 = vadd.f32 %v1332_v3, %v1328_v63  ;;  %v1164_v8 = vpop.f32.mrb[12].mxu0 }
 0x192   : > { %v596_v9 = vadd.f32 %v595_v4, %v594_v0  ;;  %v606_v10 = vadd.f32 %v1334_v5, %v1330_v1  ;;  %v570_v11 = vadd.f32 %v1164_v8, %v1845_v29  ;;  %v561_v12 = vpop.f32.mrb[13].mxu0 }
 0x193   : > { %v604_v13 = vrot.slane %v603_v6, 1  ;;  %v614_v14 = vrot.slane %v613_v7, 4  ;;  %v562_v15 = vadd.f32 %v1845_v29, %v561_v12  ;;  %v1165_v16 = vpop.f32.mrb[14].mxu0 }
 0x194   : > { %v597_v18 = vrot.slane %v596_v9, 1  ;;  %v607_v19 = vrot.slane %v606_v10, 4  ;;  %1343 = vtanh.f32 %v570_v11  ;;  %v573_v20 = vadd.f32 %v1165_v16, %v1845_v29  ;;  %v564_v21 = vpop.f32.mrb[15].mxu0 }
 0x195   : > { %v605_v22 = vadd.f32 %v604_v13, %v603_v6  ;;  %v615_v23 = vadd.f32 %v614_v14, %v613_v7  ;;  %1345 = vtanh.f32 %v562_v15  ;;  %v565_v24 = vadd.f32 %v1845_v29, %v564_v21 }
 0x196   : > { %v1336_v25 = vpop.eup %1335  ;;  %v598_v26 = vadd.f32 %v597_v18, %v596_v9  ;;  %v608_v27 = vadd.f32 %v607_v19, %v606_v10  ;;  %1347 = vtanh.f32 %v573_v20 }
 0x197   : > { %v1338_v28 = vpop.eup %1337  ;;  %v649_v30 = vmul.f32 0.0625, %v605_v22  ;;  %v616_v31 = vrot.slane %v615_v23, 2  ;;  %1349 = vtanh.f32 %v565_v24 }
 0x198   : > { %v1340_v32 = vpop.eup %1339  ;;  %v648_v33 = vmul.f32 0.0625, %v598_v26  ;;  %v609_v34 = vrot.slane %v608_v27, 2 }
 0x199   : > { %v1342_v35 = vpop.eup %1341  ;;  %v657_v36 = vpack.c.bf16 %v649_v30, %v649_v30  ;;  %v617_v37 = vadd.f32 %v616_v31, %v615_v23  ;;  %v627_v38 = vadd.f32 %v1340_v32, %v1336_v25 }
 0x19a   : > { %v656_v39 = vpack.c.bf16 %v648_v33, %v648_v33  ;;  %v610_v40 = vadd.f32 %v609_v34, %v608_v27  ;;  %v620_v41 = vadd.f32 %v1342_v35, %v1338_v28 }
 0x19b   : > { %v696_v42 = vunpack.c.l.b16 %v657_v36  ;;  %v618_v29 = vrot.slane %v617_v37, 1  ;;  %v628_v43 = vrot.slane %v627_v38, 4 }
 0x19c   : > { %v695_v44 = vunpack.c.l.b16 %v656_v39  ;;  %v611_v45 = vrot.slane %v610_v40, 1  ;;  %v621_v46 = vrot.slane %v620_v41, 4 }
 0x19d   : > { %v619_v47 = vadd.f32 %v618_v29, %v617_v37  ;;  %v629_v48 = vadd.f32 %v628_v43, %v627_v38  ;;  %v1317_v29 = vld [vmem:[#allocation8 + $0x30] sm:$0xff]   ;;  %v1318_v43 = vld [vmem:[#allocation8 + $0x38] sm:$0xff]  }
 0x19e   : > { %v1344_v49 = vpop.eup %1343  ;;  %v612_v50 = vadd.f32 %v611_v45, %v610_v40  ;;  %v622_v51 = vadd.f32 %v621_v46, %v620_v41  ;;  %v704_v52 = vsel %vm703_vm1, %v696_v42, %v695_v44  ;;  %v1315_v41 = vld [vmem:[#allocation8 + $0x20] sm:$0xff]   ;;  %v1316_v42 = vld [vmem:[#allocation8 + $0x28] sm:$0xff]  }
 0x19f   : > { %v1346_v53 = vpop.eup %1345  ;;  %v651_v54 = vmul.f32 0.0625, %v619_v47  ;;  %v630_v55 = vrot.slane %v629_v48, 2  ;;  %1195 = vmatpush3.bf16.msra.mxu0 %v1315_v41  ;;  %v1076_v44 = vld [vmem:[%s1925_s4] ss:$0 sm:$0xff] }
 0x1a0   : > { %v1348_v56 = vpop.eup %1347  ;;  %v650_v57 = vmul.f32 0.0625, %v612_v50  ;;  %v623_v58 = vrot.slane %v622_v51, 2  ;;  %1196 = vmatprep.subr.bf16.mxu0 %v1553_v17 }
 0x1a1   : > { %v1350_v59 = vpop.eup %1349  ;;  %v631_v60 = vadd.f32 %v630_v55, %v629_v48  ;;  %v641_v61 = vadd.f32 %v1348_v56, %v1344_v49  ;;  %v659_v62 = vpack.c.bf16 %v651_v54, %v651_v54 }
 0x1a2   : > { %v658_v63 = vpack.c.bf16 %v650_v57, %v650_v57  ;;  %v624_v0 = vadd.f32 %v623_v58, %v622_v51  ;;  %v634_v1 = vadd.f32 %v1350_v59, %v1346_v53 }
 0x1a3   : > { %v642_v2 = vrot.slane %v641_v61, 4  ;;  %v632_v3 = vrot.slane %v631_v60, 1  ;;  %v698_v9 = vunpack.c.l.b16 %v659_v62  ;;  %1197 = vmatpush3.bf16.msra.mxu0 %v1316_v42 }
 0x1a4   : > { %v697_v4 = vunpack.c.l.b16 %v658_v63  ;;  %v625_v5 = vrot.slane %v624_v0, 1  ;;  %v635_v6 = vrot.slane %v634_v1, 4  ;;  %1198 = vmatprep.subr.bf16.mxu0 %v1553_v17 }
 0x1a5   : > { %v643_v7 = vadd.f32 %v642_v2, %v641_v61  ;;  %v633_v8 = vadd.f32 %v632_v3, %v631_v60 }
 0x1a6   : > { %v636_v10 = vadd.f32 %v635_v6, %v634_v1  ;;  %v626_v11 = vadd.f32 %v625_v5, %v624_v0  ;;  %v706_v12 = vsel %vm705_vm2, %v697_v4, %v704_v52 }
 0x1a7   : > { %v644_v13 = vrot.slane %v643_v7, 2  ;;  %v653_v14 = vmul.f32 0.0625, %v633_v8  ;;  %v708_v15 = vsel %vm707_vm3, %v698_v9, %v706_v12  ;;  %1199 = vmatpush3.bf16.msra.mxu0 %v1317_v29 }
 0x1a8   : > { %v637_v16 = vrot.slane %v636_v10, 2  ;;  %v652_v18 = vmul.f32 0.0625, %v626_v11  ;;  %1200 = vmatprep.subr.bf16.mxu0 %v1553_v17  ;;  %v1085_v17 = vld [vmem:[%s1927_s6] ss:$0 sm:$0xff] }
 0x1a9   : > { %v645_v19 = vadd.f32 %v644_v13, %v643_v7  ;;  %v661_v20 = vpack.c.bf16 %v653_v14, %v653_v14 }
 0x1aa   : > { %v638_v21 = vadd.f32 %v637_v16, %v636_v10  ;;  %v660_v22 = vpack.c.bf16 %v652_v18, %v652_v18 }
 0x1ab   : > { %v646_v23 = vrot.slane %v645_v19, 1  ;;  %v700_v27 = vunpack.c.l.b16 %v661_v20  ;;  %1201 = vmatpush3.bf16.msra.mxu0 %v1318_v43 }
 0x1ac   : > { %v639_v24 = vrot.slane %v638_v21, 1  ;;  %v699_v25 = vunpack.c.l.b16 %v660_v22 }
 0x1ad   : > { %v647_v26 = vadd.f32 %v646_v23, %v645_v19 }
 0x1ae   : > { %v640_v28 = vadd.f32 %v639_v24, %v638_v21  ;;  %v710_v30 = vsel %vm709_vm4, %v699_v25, %v708_v15 }
 0x1af   : > { %v655_v31 = vmul.f32 0.0625, %v647_v26  ;;  %v712_v32 = vsel %vm711_vm5, %v700_v27, %v710_v30 }
 0x1b0   : > { %v654_v33 = vmul.f32 0.0625, %v640_v28 }
 0x1b1   : > { %v663_v34 = vpack.c.bf16 %v655_v31, %v655_v31 }
 0x1b2   : > { %v662_v35 = vpack.c.bf16 %v654_v33, %v654_v33 }
 0x1b3   : > { %v702_v37 = vunpack.c.l.b16 %v663_v34 }
 0x1b4   : > { %v701_v36 = vunpack.c.l.b16 %v662_v35 }
 0x1b6   : > { %v714_v38 = vsel %vm713_vm6, %v701_v36, %v712_v32 }
 0x1b7   : > { %v716_v39 = vsel %vm715_vm7, %v702_v37, %v714_v38 }
 0x1b8   : > { %v717_v40 = vpack.c.b16 %v716_v39, %v716_v39 }
 0x1ba   : > { %1183 = vmatmul.mubr.bf16.vlgmr.msra.gmra.mrb[0].mxu1 %v717_v40 }
 0x28d   : > { %v801_v45 = vpop.f32.mrb[0].mxu1 }
 0x28e   : > { %v802_v46 = vadd.f32 %v1076_v44, %v801_v45  ;;  %v1184_v47 = vpop.f32.mrb[1].mxu1 }
 0x28f   : > { %v804_v48 = vpop.f32.mrb[2].mxu1 }
 0x290   : > { %1351 = vtanh.f32 %v802_v46  ;;  %v1185_v49 = vpop.f32.mrb[3].mxu1 }
 0x29a   : > { %v1352_v50 = vpop.eup %1351 }
 0x29b   : > { %v808_v51 = vpack.c.bf16 %v1352_v50, %v1352_v50 }
 0x29d   : > { %1203 = vmatmul.mubr.bf16.vlgmr.msra.gmra.mrb[16].mxu0 %v808_v51 }
 0x370   : > { %v914_v52 = vpop.f32.mrb[16].mxu0 }
 0x371   : > { %v915_v53 = vadd.f32 %v1085_v17, %v914_v52  ;;  %v1204_v54 = vpop.f32.mrb[17].mxu0 }
 0x372   : > { %v917_v55 = vpop.f32.mrb[18].mxu0 }
 0x373   : > { %920 = vmax.xlane.f32.xlu0 %v915_v53  ;;  %v1205_v56 = vpop.f32.mrb[19].mxu0 }
 0x400   : > { %v921_v57 = vpop.xlane.xlu0 %920 }
 0x401   : > { %v922_v58 = vsub.f32 %v915_v53, %v921_v57 }
 0x403   : > { %v923_v59 = vmul.f32 1.442695, %v922_v58 }
 0x405   : > { %1353 = vpow2.f32 %v923_v59 }
 0x40f   : > { %v1354_v60 = vpop.eup %1353 }
 0x410   : > { %925 = vadd.xlane.f32.xlu0 %v1354_v60 }
 0x49d   : > { %v926_v61 = vpop.xlane.xlu0 %925 }
 0x49e   : > { %1355 = vrcp.f32 %v926_v61 }
 0x4a8   : > { %v1356_v62 = vpop.eup %1355 }
 0x4a9   : > { %v928_v63 = vmul.f32 %v1356_v62, %v1354_v60 }
 0x4ab   : > { %929 = vst [vmem:[%s341_s21] sm:$0xff] %v928_v63 }
 0x4ac   : > { %1484 = shalt.err (!%p1481_p4)
}
 0x4ad   : > { %s1485_s17 = scalar_lea.hbm %s1877_s11, 128  ;;  %s1489_s14 = scalar_lea.hbm %s1928_s7, 256 }
 0x4ae   : > { %p1486_p9 = scmp.ne.s32.totalorder %s1877_s11, %s1485_s17  ;;  %p1490_p8 = scmp.lt.u32.totalorder %s1877_s11, %s1928_s7 }
 0x4af   : > { %p1491_p13 = scmp.lt.u32.totalorder %s1489_s14, %s1485_s17  ;;  %p1493_p10 = scmp.lt.u32.totalorder %s1485_s17, %s1877_s11 }
 0x4b0   : > { %p1487_p0 = pnand %p1486_p9, %p1750_p5 }
 0x4b1   : > { %p1492_p6 = por %p1491_p13, %p1490_p8 }
 0x4b2   : > { %p1488_p11 = pneg %p1487_p0 }
 0x4b3   : > { %p1494_p3 = por %p1493_p10, %p1492_p6 }
 0x4b5   : > { %p1495_p7 = pnand %p1494_p3, %p1488_p11 }
 0x4b7   : > { %1498 = shalt.err (!%p1495_p7)
}
 0x4b8   : > { %1220 = dma.vmem_to_hbm [thread:$0]  (%p1750_p5), %s1879_s16, 128, %s1877_s11, %s931_s20  }
 0x4b9 PF: > { %s1948_s21 = sld [smem:[#allocation15_spill]]  ;;  %s956_s29 = sand.u32 1, %s1533_s24  }
 0x4ba   : > { %p1950_p1 = scmp.ge.s32.totalorder %s1545_s27, 2  ;;  %s957_s23 = scalar_lea.sflag [#allocation4], %s956_s29 }
 0x4bf   : > { %p1949_p12 = scmp.ne.s32.totalorder %s1948_s21, 0 }
 0x4c1   : > { %p1237_p2 = pnand %p1950_p1, %p1949_p12 }
 0x4c3   : > { %1528 = dma.done.wait (!%p1237_p2), %s957_s23, 128  }
 0x4c4   : > { %1530 = vsyncadd (!%p1237_p2), %s957_s23, 4294967168  ;;  %p22_p4 = scmp.ge.s32.totalorder %s1736_s22, 4   ;;  %s1951_s24 = smov %s1537_s25 }
 0x4c5   : > { %s1952_s25 = smov %s1541_s26  ;;  %s1953_s26 = smov %s1746_s18 }
 0x4c6   : > { %s1954_s27 = smov %s1736_s22  ;;  %24 = sbr.rel (!%p22_p4) target bundleno = 7 (0x7), region = 105 }
 0x4cd   :  { %962 = vsyncpa [#allocation3], 1 }
 0x4ce   :  { %964 = vsyncpa [#allocation3 + $0x1], 1 }
 0x4cf   :  { %965 = vsyncpa [#allocation6], 1 }
 0x4d0   :  { %966 = vsyncpa [#allocation9], 1 }
 0x4d1   :  { %967 = vsyncpa [#allocation4], 1 }
 0x4d2   :  { %969 = vsyncpa [#allocation4 + $0x1], 1 }

</bundles_post_ra>
